<compile_context>
chip_gen: v6e
topology: v6e:2x2x1
jax: 0.10.0
libtpu: 0.0.40
codegen_flags: <defaults>
</compile_context>

<pallas_src>
import numpy as np
import jax
import jax.numpy as jnp
from jax.experimental import pallas as pl
from jax.experimental.pallas import tpu as pltpu


def _paste_kernel(scal_ref, img_ref, wm_ref, out_ref):
    """Blend one (3, tB, W) image band tile against the positioned wm band.

    scal_ref : SMEM (2,) int32  -- [first band row-tile index, apply_flag]
    img_ref  : VMEM (3, tB, W)  -- image band tile (HBM buffer aliased to out)
    wm_ref   : VMEM (4, tB, W)  -- positioned watermark band tile
                                   (RGB + alpha; zeros outside the paste box)
    out_ref  : VMEM (3, tB, W)
    """
    img = img_ref[...]

    @pl.when(scal_ref[1] != 0)
    def _():
        wm = wm_ref[...]
        a = wm[3:4]                          # (1, tB, W) alpha, broadcasts over C
        # img*(1-a) + rgb*a  ==  img + a*(rgb - img)
        out_ref[...] = img + a * (wm[:3] - img)

    @pl.when(scal_ref[1] == 0)
    def _():
        out_ref[...] = img                   # band-sized copy only; rest aliased


def _round_up(x, m):
    return ((x + m - 1) // m) * m


def _pick_band_tile_h(H, W, wh, budget_bytes=12 << 20):
    """Band-tile height: multiple of 8, double-buffered working set under
    `budget_bytes` (fits every generation's scoped-VMEM default, incl. v7x),
    and ~half the watermark height so the band grid has ~3 steps (keeps v7x's
    2 TCs / the pipeline busy) while bounding the band to ~1.5x the watermark."""
    per_row = 2 * (3 + 4 + 3) * W * 4            # img + wm + out blocks, 2 bufs, f32
    cap_vmem = max(8, (budget_bytes // per_row) // 8 * 8)
    cap_wm = max(8, _round_up((wh + 1) // 2, 8))
    return max(8, min(cap_vmem, cap_wm, _round_up(H, 8)))


def random_watermark(img, wm_rgba, position, apply_flag, *, band_tile_h=None):
    """
    img:        (3, H, W) float (f32 or bf16) in [0, 1]
    wm_rgba:    (4, wh, ww) float in [0, 1]  (RGB + alpha)
    position:   length-2 (py, px) paste offset (top-left corner); ints or traced
    apply_flag: scalar; nonzero/True = paste watermark, 0/False = pass through
    """
    C, H, W = img.shape
    assert C == 3, "RandomWatermark kernel expects an RGB (3, H, W) image"
    wh, ww = int(wm_rgba.shape[1]), int(wm_rgba.shape[2])
    assert wh <= H and ww <= W

    tB = int(band_tile_h) if band_tile_h is not None else _pick_band_tile_h(H, W, wh)
    assert tB % 8 == 0, "band_tile_h must be a multiple of 8 (sublane tiling)"
    # Static VMEM guard for manual overrides (v7x has 64 MiB/TC, 32 MiB scoped).
    assert 2 * (3 + 4 + 3) * tB * W * 4 <= (24 << 20), "band_tile_h too large for VMEM"

    num_tiles = pl.cdiv(H, tB)                         # ragged last tile is masked
    band_tiles = min(pl.cdiv(wh, tB) + 1, num_tiles)   # static grid size
    band_h = band_tiles * tB

    py = jnp.asarray(position[0], jnp.int32)
    px = jnp.asarray(position[1], jnp.int32)
    # First image row-tile covered by the band; clamped so the band never runs
    # off the bottom of the image while still covering rows [py, py + wh).
    start_tile = jnp.clip(py // tB, 0, num_tiles - band_tiles)
    band_row = py - start_tile * tB                    # wm row offset inside band

    # Small full-width band (band_h ~ 1.5*wh rows, NOT H rows) holding the
    # watermark at its final (row, col) offset; alpha == 0 elsewhere, so no
    # in-kernel gather/shift is needed and stores stay lane-dense.
    # NOTE: the module's allowed positions guarantee py+wh<=H and px+ww<=W, so
    # dynamic_update_slice never clamps (clamping would silently shift the wm).
    band = jnp.zeros((4, band_h, W), img.dtype)
    band = jax.lax.dynamic_update_slice(band, wm_rgba.astype(img.dtype),
                                        (0, band_row, px))

    scal = jnp.stack([start_tile,
                      (jnp.asarray(apply_flag) != 0).astype(jnp.int32)])

    img_spec = pl.BlockSpec((3, tB, W), lambda i, s: (0, s[0] + i, 0))
    wm_spec = pl.BlockSpec((4, tB, W), lambda i, s: (0, i, 0))

    return pl.pallas_call(
        _paste_kernel,
        out_shape=jax.ShapeDtypeStruct((3, H, W), img.dtype),
        grid_spec=pltpu.PrefetchScalarGridSpec(
            num_scalar_prefetch=1,
            grid=(band_tiles,),
            in_specs=[img_spec, wm_spec],
            out_specs=pl.BlockSpec((3, tB, W), lambda i, s: (0, s[0] + i, 0)),
        ),
        # img (call-arg index 1, after the scalar-prefetch array) is aliased to
        # output 0: rows outside the band are never read or written by the kernel.
        input_output_aliases={1: 0},
        compiler_params=pltpu.CompilerParams(
            dimension_semantics=("parallel",)),
    )(scal, img, band)


def _get_watermark_position(img_hw, wm_hw, rng):
    """Mirrors RandomWatermark._get_watermark_position (host-side numpy RNG)."""
    H, W = img_hw
    wh, ww = wm_hw
    max_w, max_h = W - ww, H - wh
    center_w, center_h = max_w // 2, max_h // 2
    px, py = center_w, center_h
    while px == center_w and py == center_h:
        px = int(rng.choice([0, center_w, max_w]))
        py = int(rng.choice([0, center_h, max_h]))
    return py, px


def _reference_paste(img, wm_rgba, py, px):
    """Pure-JAX reference of the alpha paste (for a correctness check)."""
    C, H, W = img.shape
    canvas_rgb = jax.lax.dynamic_update_slice(
        jnp.zeros((C, H, W), img.dtype), wm_rgba[:3].astype(img.dtype), (0, py, px))
    canvas_a = jax.lax.dynamic_update_slice(
        jnp.zeros((1, H, W), img.dtype), wm_rgba[3:4].astype(img.dtype), (0, py, px))
    return img * (1.0 - canvas_a) + canvas_rgb * canvas_a


if __name__ == "__main__":
    key = jax.random.PRNGKey(0)
    k_img, k_wm, k_coin = jax.random.split(key, 3)

    C, H, W = 3, 64, 256          # small image, lane/sublane friendly
    wh, ww = 16, 64               # small watermark
    p = 0.5

    img = jax.random.uniform(k_img, (C, H, W), dtype=jnp.float32)
    wm_rgba = jax.random.uniform(k_wm, (4, wh, ww), dtype=jnp.float32)

    # Host-side glue matching the PyTorch module: coin flip + random position.
    apply_flag = (jax.random.uniform(k_coin, ()) < p).astype(jnp.int32)
    rng = np.random.default_rng(0)
    py, px = _get_watermark_position((H, W), (wh, ww), rng)
    pos = jnp.array([py, px], jnp.int32)

    # Donate the image so the input->output alias is honored without an extra
    # copy (the rows outside the watermark band then never move through HBM).
    wm_fn = jax.jit(random_watermark, donate_argnums=(0,),
                    static_argnames=("band_tile_h",))

    img_np = np.asarray(img)      # host copy: the device arg is donated per call

    # Full module path (coin-flip gated inside the kernel).
    out = wm_fn(jnp.asarray(img_np), wm_rgba, pos, apply_flag)
    jax.block_until_ready(out)
    assert out.shape == (C, H, W) and out.dtype == jnp.float32

    # Force the paste path and verify against the pure-JAX reference.
    ref_on = np.asarray(_reference_paste(img, wm_rgba, py, px))
    out_on = np.asarray(wm_fn(jnp.asarray(img_np), wm_rgba, pos, jnp.int32(1)))
    np.testing.assert_allclose(out_on, ref_on, rtol=1e-6, atol=1e-6)

    # Force the pass-through path: output must equal the input exactly.
    out_off = np.asarray(wm_fn(jnp.asarray(img_np), wm_rgba, pos, jnp.int32(0)))
    np.testing.assert_array_equal(out_off, img_np)

    print("KERNEL_OK")
</pallas_src>

<mosaic_0001>
module attributes {stable_mosaic.version = 11 : i64} {
  func.func @_paste_kernel(%arg0: i32, %arg1: memref<2xi32, #tpu.memory_space<smem>>, %arg2: memref<3x8x256xf32, #tpu.memory_space<vmem>>, %arg3: memref<4x8x256xf32, #tpu.memory_space<vmem>>, %arg4: memref<3x8x256xf32, #tpu.memory_space<vmem>>) attributes {dimension_semantics = [#tpu.dimension_semantics<parallel>], iteration_bounds = array<i64: 3>, scalar_prefetch = 1 : i64, scratch_operands = 0 : i64, tpu.core_type = #tpu.core_type<tc>, window_params = [{transform_indices = @transform_0, window_bounds = array<i64: 3, 8, 256>}, {transform_indices = @transform_1, window_bounds = array<i64: 4, 8, 256>}, {transform_indices = @transform_2, window_bounds = array<i64: 3, 8, 256>}]} {
    %c0 = arith.constant 0 : index
    %c0_0 = arith.constant 0 : index
    %c0_1 = arith.constant 0 : index
    %0 = vector.load %arg2[%c0, %c0_0, %c0_1] : memref<3x8x256xf32, #tpu.memory_space<vmem>>, vector<3x8x256xf32>
    %c1 = arith.constant 1 : index
    %1 = memref.load %arg1[%c1] : memref<2xi32, #tpu.memory_space<smem>>
    %c0_i32 = arith.constant 0 : i32
    %2 = arith.cmpi ne, %1, %c0_i32 : i32
    %3 = arith.extui %2 : i1 to i32
    %c0_i32_2 = arith.constant 0 : i32
    %4 = arith.cmpi ne, %3, %c0_i32_2 : i32
    scf.if %4 {
      %c0_6 = arith.constant 0 : index
      %c0_7 = arith.constant 0 : index
      %c0_8 = arith.constant 0 : index
      %9 = vector.load %arg3[%c0_6, %c0_7, %c0_8] : memref<4x8x256xf32, #tpu.memory_space<vmem>>, vector<4x8x256xf32>
      %10 = vector.extract_strided_slice %9 {offsets = [3, 0, 0], sizes = [1, 8, 256], strides = [1, 1, 1]} : vector<4x8x256xf32> to vector<1x8x256xf32>
      %11 = vector.extract_strided_slice %9 {offsets = [0, 0, 0], sizes = [3, 8, 256], strides = [1, 1, 1]} : vector<4x8x256xf32> to vector<3x8x256xf32>
      %12 = arith.subf %11, %0 : vector<3x8x256xf32>
      %13 = vector.broadcast %10 : vector<1x8x256xf32> to vector<3x8x256xf32>
      %14 = arith.mulf %13, %12 : vector<3x8x256xf32>
      %15 = arith.addf %0, %14 : vector<3x8x256xf32>
      %c0_9 = arith.constant 0 : index
      %c0_10 = arith.constant 0 : index
      %c0_11 = arith.constant 0 : index
      %16 = vector.load %arg4[%c0_9, %c0_10, %c0_11] : memref<3x8x256xf32, #tpu.memory_space<vmem>>, vector<3x8x256xf32>
      tpu.vector_store %arg4[%c0_9, %c0_10, %c0_11], %15 {strides = array<i32>} : memref<3x8x256xf32, #tpu.memory_space<vmem>>, vector<3x8x256xf32>,
    } else {
    }
    %c1_3 = arith.constant 1 : index
    %5 = memref.load %arg1[%c1_3] : memref<2xi32, #tpu.memory_space<smem>>
    %c0_i32_4 = arith.constant 0 : i32
    %6 = arith.cmpi eq, %5, %c0_i32_4 : i32
    %7 = arith.extui %6 : i1 to i32
    %c0_i32_5 = arith.constant 0 : i32
    %8 = arith.cmpi ne, %7, %c0_i32_5 : i32
    scf.if %8 {
      %c0_6 = arith.constant 0 : index
      %c0_7 = arith.constant 0 : index
      %c0_8 = arith.constant 0 : index
      %9 = vector.load %arg4[%c0_6, %c0_7, %c0_8] : memref<3x8x256xf32, #tpu.memory_space<vmem>>, vector<3x8x256xf32>
      tpu.vector_store %arg4[%c0_6, %c0_7, %c0_8], %0 {strides = array<i32>} : memref<3x8x256xf32, #tpu.memory_space<vmem>>, vector<3x8x256xf32>,
    } else {
    }
    return
  }
  func.func @transform_0(%arg0: i32, %arg1: memref<2xi32, #tpu.memory_space<smem>>) -> (i32, i32, i32) {
    %c0 = arith.constant 0 : index
    %0 = memref.load %arg1[%c0] : memref<2xi32, #tpu.memory_space<smem>>
    %1 = arith.addi %0, %arg0 : i32
    %c0_i32 = arith.constant 0 : i32
    %c0_i32_0 = arith.constant 0 : i32
    %c0_i32_1 = arith.constant 0 : i32
    return %c0_i32, %1, %c0_i32_0 : i32, i32, i32
  }
  func.func @transform_1(%arg0: i32, %arg1: memref<2xi32, #tpu.memory_space<smem>>) -> (i32, i32, i32) {
    %c0_i32 = arith.constant 0 : i32
    %c0_i32_0 = arith.constant 0 : i32
    %c0_i32_1 = arith.constant 0 : i32
    return %c0_i32, %arg0, %c0_i32_0 : i32, i32, i32
  }
  func.func @transform_2(%arg0: i32, %arg1: memref<2xi32, #tpu.memory_space<smem>>) -> (i32, i32, i32) {
    %c0 = arith.constant 0 : index
    %0 = memref.load %arg1[%c0] : memref<2xi32, #tpu.memory_space<smem>>
    %1 = arith.addi %0, %arg0 : i32
    %c0_i32 = arith.constant 0 : i32
    %c0_i32_0 = arith.constant 0 : i32
    %c0_i32_1 = arith.constant 0 : i32
    return %c0_i32, %1, %c0_i32_0 : i32, i32, i32
  }
}

</mosaic_0001>

<bundles_post_ra>
// kernel: random_watermark.1
= control target key start
LH: loop header
LB: loop body
LE: loop exit
PB: predicated region body
PF: predicated region fallthrough
CT: control target
= control target key end

     0   :  { %s923_s0 = inlined_call_operand.vmem [shape: s32[2], index: 0, kind: input, shape index: {}]   ;;  %s924_s1 = inlined_call_operand.hbm [shape: f32[3,64,256], index: 1, kind: input, shape index: {}, may-alias: {1,3}]   ;;  %s925_s2 = inlined_call_operand.vmem [shape: f32[4,24,256], index: 2, kind: input, shape index: {}]   ;;  %s926_s3 = inlined_call_operand.hbm [shape: f32[3,64,256], index: 3, kind: output, shape index: {}, may-alias: {1,3}]  }
   0x1   :  { %s8_s14 = sshll.u32 %s923_s0, 4  ;;  %s9_s14 = int_to_ptr.vmem [resolvable:$true] %s8_s14 }
   0x2   :  { %s512_s15 = scalar_lea.vmem %s9_s14, 16  ;;  %p517_p1 = scmp.lt.s32.totalorder %s9_s14, %s9_s14 }
   0x3   :  { %p513_p0 = scmp.ne.s32.totalorder %s9_s14, %s512_s15  ;;  %p518_p2 = scmp.lt.s32.totalorder %s512_s15, %s512_s15 }
   0x5   :  { %p519_p3 = por %p518_p2, %p517_p1 }
   0x7   :  { %p520_p4 = pnand %p519_p3, %p513_p0 }
   0x9   :  { %523 = shalt.err (!%p520_p4)  }
   0xa   :  { %s658_s16 = smov [#allocation3]  }
   0xb   :  { %11 = dma.vmem_to_smem %s9_s14, 16, %s658_s16, [#allocation2] }
   0xc   :  { %612 = dma.done.wait [#allocation2], 16 }
   0xd   :  { %613 = vsyncadd [#allocation2], 4294967280 }
   0xe   :  { %13 = sfence }
   0xf   :  { %14 = vsyncpa [#allocation5], 0 }
  0x10   :  { %16 = vsyncpa [#allocation5 + $0x1], 0 }
  0x11   :  { %17 = vsyncpa [#allocation6], 0 }
  0x12   :  { %19 = vsyncpa [#allocation6 + $0x1], 0  ;;  %s690_s17 = smov 0   ;;  %s692_s0 = smov 0  }
  0x13   :  { %s694_s18 = smov 0   ;;  %s696_s19 = smov 0  }
  0x14   :  { %s698_s20 = smov 0   ;;  %s700_s21 = smov 0  }
  0x15   :  { %s702_s22 = smov 0   ;;  %s704_s23 = smov 0  }
  0x16   :  { %s706_s24 = smov 0  }
  0x17 LB: > { %930 = sst [smem:[#allocation12_spill]] %s652_s23  ;;  %s734_s25 = sadd.s32 4294967295, %s656_s24   ;;  %s656_s24 = sphi %s706_s24, %s951_s24   ;;  %s652_s23 = sphi %s704_s23, %s943_s23   ;;  %s648_s22 = sphi %s702_s22, %s950_s22   ;;  %s644_s21 = sphi %s700_s21, %s949_s21   ;;  %s640_s20 = sphi %s698_s20, %s948_s20   ;;  %s636_s19 = sphi %s696_s19, %s947_s19   ;;  %s632_s18 = sphi %s694_s18, %s946_s18   ;;  %s628_s0 = sphi %s692_s0, %s945_s0   ;;  %s624_s17 = sphi %s690_s17, %s944_s17  }
  0x18   : > { %s400_s26 = sadd.s32 4294967294, %s656_s24   ;;  %s738_s27 = sadd.s32 1, %s656_s24  }
  0x19   : > { %s29_s28 = sld [smem:[#allocation3]]  ;;  %s36_s29 = sadd.s32 1, %s652_s23 }
  0x1a   : > { %p43_p5 = scmp.ne.s32.totalorder %s652_s23, %s648_s22  ;;  %p44_p6 = scmp.eq.s32.totalorder %s656_s24, 0 }
  0x1b   : > { %p49_p7 = scmp.ne.s32.totalorder %s648_s22, %s644_s21  ;;  %p50_p8 = scmp.eq.s32.totalorder %s734_s25, 0 }
  0x1c   : > { %s59_s30 = ssub.s32 %s656_s24, %s738_s27  ;;  %p750_p9 = por %p44_p6, %p43_p5 }
  0x1d   : > { %p60_p10 = scmp.eq.s32.totalorder %s59_s30, 0  ;;  %p754_p11 = por %p50_p8, %p49_p7 }
  0x1e   : > { %s62_s6 = sadd.s32 1, %s640_s20  ;;  %p69_p12 = scmp.ne.s32.totalorder %s640_s20, %s636_s19 }
  0x1f   : > { %s932_s5 = scalar_select %p754_p11, 1, 0 }
  0x20   : > { %s30_s7 = sadd.s32 %s656_s24, %s29_s28  ;;  %s32_s8 = sadd.s32 %s29_s28, %s738_s27 }
  0x21   : > { %s33_s9 = ssub.s32 %s30_s7, %s32_s8  ;;  %s92_s10 = sadd.s32 1, %s632_s18 }
  0x22   : > { %p34_p13 = scmp.eq.s32.totalorder %s33_s9, 0  ;;  %p772_p0 = por %p69_p12, %p44_p6 }
  0x23   : > { %s765_s11 = scalar_select %p60_p10, %s640_s20, %s62_s6  }
  0x24   : > { %s768_s12 = scalar_select %p34_p13, %s652_s23, %s36_s29  }
  0x25   : > { %933 = sst [smem:[#allocation13_spill]] %s765_s11  ;;  %p102_p1 = scmp.ne.s32.totalorder %s632_s18, %s628_s0 }
  0x26   : > { %934 = sst [smem:[#allocation14_spill]] %s768_s12  ;;  %p103_p2 = scmp.eq.s32.totalorder %s734_s25, 2 }
  0x27   : > { %s779_s14 = scalar_select %p34_p13, %s632_s18, %s92_s10  }
  0x28   : > { %p108_p3 = scmp.ne.s32.totalorder %s628_s0, %s624_s17  ;;  %p109_p4 = scmp.eq.s32.totalorder %s400_s26, 2 }
  0x29   : > { %p784_p5 = por %p103_p2, %p102_p1  ;;  %p402_p8 = scmp.ge.s32.totalorder %s656_s24, 3 }
  0x2a   : > { %p788_p7 = por %p109_p4, %p108_p3  ;;  %s129_s21 = sand.u32 (!%p402_p8), 1, %s652_s23  }
  0x2b   : > { %s936_s15 = scalar_select %p784_p5, 1, 0 }
  0x2c   : > { %s937_s16 = scalar_select %p788_p7, 1, 0 }
  0x2d   : > { %125 = sbr.rel (%p402_p8) target bundleno = 84 (0x54), region = 16  ;;  %s134_s28 = sld [smem:[#allocation3]] (!%p402_p8) }
  0x2e   : > { %s421_s29 = smul.u32 (!%p402_p8), 48, %s129_s21  ;;  %s802_s12 = scalar_lea.sflag (!%p402_p8), [#allocation5], %s129_s21 }
  0x30   : > { %s133_s30 = scalar_lea.vmem (!%p402_p8), [#allocation4], %s421_s29 }
  0x31   : > { %s142_s6 = sshll.u32 (!%p402_p8), %s133_s30, 4  ;;  %s528_s30 = scalar_lea.hbm (!%p402_p8), %s924_s1, 6144  ;;  %s795_s6 = int_to_ptr.vmem [resolvable:$true] %s142_s6 }
  0x33   : > { %s135_s26 = sadd.s32 %s656_s24, %s134_s28 }
  0x34   : > { %s418_s7 = sshll.u32 %s135_s26, 8 }
  0x35   : > { %s800_s10 = scalar_lea.hbm %s924_s1, %s418_s7 }
  0x36   : > { %s524_s11 = scalar_lea.hbm %s800_s10, 768  ;;  %p529_p13 = scmp.lt.s32.totalorder %s800_s10, %s924_s1 }
  0x37   : > { %p525_p6 = scmp.ne.s32.totalorder %s800_s10, %s524_s11  ;;  %p530_p1 = scmp.lt.s32.totalorder %s528_s30, %s524_s11 }
  0x39   : > { %p526_p10 = pnand %p525_p6, %p750_p9  ;;  %p531_p2 = por %p530_p1, %p529_p13 }
  0x3b   : > { %p527_p12 = pneg %p526_p10 }
  0x3d   : > { %p532_p3 = pnand %p531_p2, %p527_p12 }
  0x3f   : > { %535 = shalt.err (!%p532_p3)
}
  0x40   : > { %s536_s21 = scalar_lea.vmem %s795_s6, 768  ;;  %s659_s7 = smov [#allocation4]  }
  0x41   : > { %p537_p4 = scmp.ne.s32.totalorder %s795_s6, %s536_s21  ;;  %s540_s8 = sshll.u32 %s659_s7, 4  ;;  %s541_s8 = int_to_ptr.vmem [resolvable:$false] %s540_s8 }
  0x42   : > { %s542_s9 = scalar_lea.vmem %s541_s8, 1536  ;;  %p543_p10 = scmp.lt.s32.totalorder %s795_s6, %s541_s8 }
  0x43   : > { %p538_p8 = pnand %p537_p4, %p750_p9  ;;  %p544_p7 = scmp.lt.s32.totalorder %s542_s9, %s536_s21 }
  0x45   : > { %p539_p6 = pneg %p538_p8  ;;  %p545_p5 = por %p544_p7, %p543_p10 }
  0x47   : > { %p546_p11 = pnand %p545_p5, %p539_p6 }
  0x49   : > { %549 = shalt.err (!%p546_p11)
}
  0x4a   : > { %s660_s23 = smov 2048   ;;  %s661_s11 = smov 256  }
  0x4b   : > { %s662_s29 = smov 16   ;;  %151 = sbr.rel (!%p772_p0) target bundleno = 84 (0x54), region = 24 }
  0x4c   : > { %424 = dma.hbm_to_vmem [thread:$0]  (%p750_p9), %s800_s10, 768, %s795_s6, %s802_s12, %s660_s23, %s661_s11, %s662_s29  }
  0x4d   : > { %s153_s28 = sand.u32 (%p772_p0), 1, %s640_s20   ;;  %s419_s30 = sshll.u32 (%p772_p0), %s656_s24, 4 }
  0x4e   : > { %s405_s26 = sshll.u32 (%p772_p0), %s153_s28, 6  ;;  %s158_s8 = scalar_lea.vmem (%p772_p0), %s925_s2, %s419_s30 }
  0x4f   : > { %v171_v0 = vld [vmem:[%s158_s8] sm:$0xff] (%p772_p0)  ;;  %v173_v1 = vld [vmem:[%s158_s8 + $0x8] sm:$0xff] (%p772_p0)  ;;  %v175_v2 = vld [vmem:[%s158_s8 + $0x30] sm:$0xff] (%p772_p0)  ;;  %s155_s9 = scalar_lea.vmem (%p772_p0), [#allocation7], %s405_s26 }
  0x50   : > { %172 = vst [vmem:[%s155_s9] sm:$0xff] %v171_v0  ;;  %174 = vst [vmem:[%s155_s9 + $0x8] sm:$0xff] %v173_v1  ;;  %v177_v3 = vld [vmem:[%s158_s8 + $0x38] sm:$0xff]  ;;  %v179_v4 = vld [vmem:[%s158_s8 + $0x60] sm:$0xff] }
  0x51   : > { %176 = vst [vmem:[%s155_s9 + $0x10] sm:$0xff] %v175_v2  ;;  %v181_v5 = vld [vmem:[%s158_s8 + $0x68] sm:$0xff]  ;;  %178 = vst [vmem:[%s155_s9 + $0x18] sm:$0xff] %v177_v3  ;;  %v183_v6 = vld [vmem:[%s158_s8 + $0x90] sm:$0xff] }
  0x52   : > { %180 = vst [vmem:[%s155_s9 + $0x20] sm:$0xff] %v179_v4  ;;  %182 = vst [vmem:[%s155_s9 + $0x28] sm:$0xff] %v181_v5  ;;  %v185_v7 = vld [vmem:[%s158_s8 + $0x98] sm:$0xff] }
  0x53   : > { %184 = vst [vmem:[%s155_s9 + $0x30] sm:$0xff] %v183_v6  ;;  %186 = vst [vmem:[%s155_s9 + $0x38] sm:$0xff] %v185_v7 }
  0x54 PF: > { %p408_p9 = scmp.ge.s32.totalorder %s656_s24, 1  ;;  %p191_p11 = scmp.lt.s32.totalorder %s656_s24, 4 }
  0x56   : > { %p192_p0 = pnand %p408_p9, %p191_p11 }
  0x57   : > { %s197_s4 = sand.u32 (!%p192_p0), 1, %s648_s22   ;;  %p938_p5 = scmp.ne.s32.totalorder (!%p192_p0), %s932_s5, 0 }
  0x58   : > { %195 = sbr.rel (%p192_p0) target bundleno = 161 (0xa1), region = 47  ;;  %s198_s13 = scalar_lea.sflag (!%p192_p0), [#allocation5], %s197_s4 }
  0x59   : > { %s422_s12 = smul.u32 (!%p192_p0), 48, %s197_s4 }
  0x5b   : > { %s201_s6 = scalar_lea.vmem (!%p192_p0), [#allocation4], %s422_s12 }
  0x5d   : > { %615 = dma.done.wait (%p938_p5), %s198_s13, 768  }
  0x5e   : > { %617 = vsyncadd (%p938_p5), %s198_s13, 4294966528  ;;  %s207_s10 = sand.u32 1, %s636_s19   ;;  %s230_s23 = sand.u32 1, %s628_s0   ;;  %v237_v8 = vld [vmem:[%s201_s6] sm:$0xff]  ;;  %v238_v9 = vld [vmem:[%s201_s6 + $0x8] sm:$0xff] }
  0x5f   : > { %s410_s11 = sld [smem:[#allocation3 + $0x1]]  ;;  %s409_s29 = sshll.u32 %s207_s10, 6  ;;  %v239_v10 = vld [vmem:[%s201_s6 + $0x10] sm:$0xff]  ;;  %v240_v11 = vld [vmem:[%s201_s6 + $0x18] sm:$0xff]  ;;  %v241_v12 = vld [vmem:[%s201_s6 + $0x20] sm:$0xff] }
  0x60   : > { %s423_s28 = smul.u32 48, %s230_s23  ;;  %v242_v13 = vld [vmem:[%s201_s6 + $0x28] sm:$0xff]  ;;  %s209_s30 = scalar_lea.vmem [#allocation7], %s409_s29 }
  0x62   : > { %s843_s26 = scalar_lea.vmem [#allocation8], %s423_s28 }
  0x65   : > { %p411_p7 = scmp.eq.s32.totalorder %s410_s11, 0 }
  0x67   : > { %247 = sbr.rel (%p411_p7) target bundleno = 118 (0x76), region = 59 }
  0x6c   : > { %v248_v14 = vld [vmem:[%s209_s30] sm:$0xff]  ;;  %v254_v15 = vld [vmem:[%s209_s30 + $0x30] sm:$0xff]  ;;  %v249_v16 = vld [vmem:[%s209_s30 + $0x8] sm:$0xff] }
  0x6d   : > { %v256_v17 = vsub.f32 %v248_v14, %v237_v8  ;;  %v255_v18 = vld [vmem:[%s209_s30 + $0x38] sm:$0xff]  ;;  %v257_v19 = vsub.f32 %v249_v16, %v238_v9  ;;  %v250_v20 = vld [vmem:[%s209_s30 + $0x10] sm:$0xff]  ;;  %v252_v24 = vld [vmem:[%s209_s30 + $0x20] sm:$0xff] }
  0x6e   : > { %v251_v21 = vld [vmem:[%s209_s30 + $0x18] sm:$0xff]  ;;  %v258_v22 = vsub.f32 %v250_v20, %v239_v10  ;;  %v253_v25 = vld [vmem:[%s209_s30 + $0x28] sm:$0xff]  ;;  %v260_v28 = vsub.f32 %v252_v24, %v241_v12 }
  0x6f   : > { %v259_v23 = vsub.f32 %v251_v21, %v240_v11  ;;  %v262_v26 = vmul.f32 %v256_v17, %v254_v15  ;;  %v263_v27 = vmul.f32 %v257_v19, %v255_v18  ;;  %v261_v29 = vsub.f32 %v253_v25, %v242_v13 }
  0x70   : > { %v264_v30 = vmul.f32 %v258_v22, %v254_v15  ;;  %v266_v34 = vmul.f32 %v260_v28, %v254_v15 }
  0x71   : > { %v265_v31 = vmul.f32 %v259_v23, %v255_v18  ;;  %v268_v32 = vadd.f32 %v262_v26, %v237_v8  ;;  %v269_v33 = vadd.f32 %v263_v27, %v238_v9  ;;  %v267_v35 = vmul.f32 %v261_v29, %v255_v18 }
  0x72   : > { %v270_v36 = vadd.f32 %v264_v30, %v239_v10  ;;  %v272_v38 = vadd.f32 %v266_v34, %v241_v12 }
  0x73   : > { %v271_v37 = vadd.f32 %v265_v31, %v240_v11  ;;  %274 = vst [vmem:[%s843_s26] sm:$0xff] %v268_v32  ;;  %275 = vst [vmem:[%s843_s26 + $0x8] sm:$0xff] %v269_v33  ;;  %v273_v39 = vadd.f32 %v267_v35, %v242_v13 }
  0x74   : > { %276 = vst [vmem:[%s843_s26 + $0x10] sm:$0xff] %v270_v36  ;;  %278 = vst [vmem:[%s843_s26 + $0x20] sm:$0xff] %v272_v38 }
  0x75   : > { %277 = vst [vmem:[%s843_s26 + $0x18] sm:$0xff] %v271_v37  ;;  %279 = vst [vmem:[%s843_s26 + $0x28] sm:$0xff] %v273_v39 }
  0x76 PF: > { %s412_s19 = sld [smem:[#allocation3 + $0x1]] }
  0x7c   : > { %p413_p12 = scmp.ne.s32.totalorder %s412_s19, 0 }
  0x7e   : > { %284 = sbr.rel (%p413_p12) target bundleno = 134 (0x86), region = 63 }
  0x83   : > { %285 = vst [vmem:[%s843_s26] sm:$0xff] %v237_v8  ;;  %286 = vst [vmem:[%s843_s26 + $0x8] sm:$0xff] %v238_v9 }
  0x84   : > { %287 = vst [vmem:[%s843_s26 + $0x10] sm:$0xff] %v239_v10  ;;  %288 = vst [vmem:[%s843_s26 + $0x18] sm:$0xff] %v240_v11 }
  0x85   : > { %289 = vst [vmem:[%s843_s26 + $0x20] sm:$0xff] %v241_v12  ;;  %290 = vst [vmem:[%s843_s26 + $0x28] sm:$0xff] %v242_v13 }
  0x86 PF: > { %s299_s5 = sld [smem:[#allocation3]]  ;;  %s307_s21 = sshll.u32 %s843_s26, 4  ;;  %s858_s21 = int_to_ptr.vmem [resolvable:$true] %s307_s21 }
  0x87   : > { %s868_s13 = scalar_lea.sflag [#allocation6], %s230_s23  ;;  %s550_s6 = scalar_lea.vmem %s858_s21, 768 }
  0x88   : > { %p551_p13 = scmp.ne.s32.totalorder %s858_s21, %s550_s6  ;;  %p939_p1 = scmp.ne.s32.totalorder %s936_s15, 0 }
  0x89   : > { %s663_s10 = smov [#allocation8]  }
  0x8a   : > { %p552_p2 = pnand %p551_p13, %p939_p1  ;;  %s554_s11 = sshll.u32 %s663_s10, 4  ;;  %s555_s11 = int_to_ptr.vmem [resolvable:$false] %s554_s11 }
  0x8b   : > { %s556_s29 = scalar_lea.vmem %s555_s11, 1536  ;;  %p557_p4 = scmp.lt.s32.totalorder %s858_s21, %s555_s11 }
  0x8c   : > { %s300_s7 = sadd.s32 %s734_s25, %s299_s5  ;;  %p553_p3 = pneg %p552_p2 }
  0x8d   : > { %s420_s8 = sshll.u32 %s300_s7, 8  ;;  %p558_p8 = scmp.lt.s32.totalorder %s556_s29, %s550_s6 }
  0x8e   : > { %s864_s12 = scalar_lea.hbm %s926_s3, %s420_s8 }
  0x8f   : > { %p559_p6 = por %p558_p8, %p557_p4 }
  0x91   : > { %p560_p10 = pnand %p559_p6, %p553_p3 }
  0x93   : > { %563 = shalt.err (!%p560_p10)
}
  0x94   : > { %s564_s25 = scalar_lea.hbm %s864_s12, 768  ;;  %s568_s30 = scalar_lea.hbm %s926_s3, 6144 }
  0x95   : > { %p565_p9 = scmp.ne.s32.totalorder %s864_s12, %s564_s25  ;;  %p569_p5 = scmp.lt.s32.totalorder %s864_s12, %s926_s3 }
  0x96   : > { %p570_p7 = scmp.lt.s32.totalorder %s568_s30, %s564_s25 }
  0x97   : > { %p566_p11 = pnand %p565_p9, %p939_p1 }
  0x98   : > { %p571_p12 = por %p570_p7, %p569_p5 }
  0x99   : > { %p567_p0 = pneg %p566_p11 }
  0x9b   : > { %p572_p13 = pnand %p571_p12, %p567_p0 }
  0x9d   : > { %575 = shalt.err (!%p572_p13)
}
  0x9e   : > { %s664_s5 = smov 256   ;;  %s665_s7 = smov 2048  }
  0x9f   : > { %s666_s8 = smov 16  }
  0xa0   : > { %426 = dma.vmem_to_hbm [thread:$0]  (%p939_p1), %s858_s21, 768, %s864_s12, %s868_s13, %s664_s5, %s665_s7, %s666_s8  }
  0xa1 PF: > { %p432_p2 = scmp.ge.s32.totalorder %s656_s24, 2  ;;  %s322_s9 = sand.u32 1, %s624_s17  }
  0xa2   : > { %p940_p3 = scmp.ne.s32.totalorder %s937_s16, 0  ;;  %s323_s4 = scalar_lea.sflag [#allocation6], %s322_s9 }
  0xa4   : > { %p429_p4 = pnand %p432_p2, %p940_p3 }
  0xa6   : > { %p430_p8 = pneg %p429_p4 }
  0xa8   : > { %619 = dma.done.wait (%p430_p8), %s323_s4, 768  }
  0xa9   : > { %621 = vsyncadd (%p430_p8), %s323_s4, 4294966528  ;;  %s941_s6 = sld [smem:[#allocation13_spill]]  ;;  %p22_p1 = scmp.ge.s32.totalorder %s738_s27, 5  }
  0xaa   : > { %s942_s15 = sld [smem:[#allocation12_spill]]  ;;  %s944_s17 = smov %s628_s0 }
  0xab   : > { %s943_s23 = sld [smem:[#allocation14_spill]]  ;;  %s945_s0 = smov %s632_s18 }
  0xac   : > { %s946_s18 = smov %s779_s14  ;;  %s947_s19 = smov %s640_s20 }
  0xad   : > { %s949_s21 = smov %s648_s22  ;;  %s951_s24 = smov %s738_s27 }
  0xae   :  { %24 = sbr.rel (!%p22_p1) target bundleno = 23 (0x17), region = 112 }
  0xaf   : > { %s948_s20 = smov %s941_s6 }
  0xb0   : > { %s950_s22 = smov %s942_s15 }
  0xb3   :  { %328 = vsyncpa [#allocation5], 1 }
  0xb4   :  { %330 = vsyncpa [#allocation5 + $0x1], 1 }
  0xb5   :  { %331 = vsyncpa [#allocation6], 1 }
  0xb6   :  { %333 = vsyncpa [#allocation6 + $0x1], 1 }

</bundles_post_ra>
